<compile_context>
chip_gen: v5e
topology: v5e:2x2
jax: 0.10.0
libtpu: 0.0.40
codegen_flags: <defaults>
</compile_context>

<pallas_src>
import functools

import jax
import jax.numpy as jnp
import numpy as np
from jax.experimental import pallas as pl
from jax.experimental.pallas import tpu as pltpu


def _round_up(x, m):
    return ((x + m - 1) // m) * m


# --------------------------------------------------------------------------
# Fused kernel (all layers statically unrolled, 6 refs total)
# --------------------------------------------------------------------------
def _make_fused_kernel(num_layers):
    def kernel(x_ref, g_ref, s_ref, w_ref, b_ref, o_ref):
        # x_ref : (1, R)            packed activation row [re | im | 0]
        # g_ref : (L, I_pad, R)     Gamma packed [re | im | 0], zero-padded
        # s_ref : (L, I_pad, 1)     -1/(2*sigma) column
        # w_ref : (L, I_pad, R)     [W_re^T | W_im^T | 0], zero-padded
        # b_ref : (L, 1, R)         [b_re | b_im | 0]
        # o_ref : (1, R)            packed output row
        y = x_ref[...]                                      # (1, R)
        for l in range(num_layers):                         # static unroll
            # RBF distance, subtract-then-square form (VPU + XLU lane reduce).
            diff = y - g_ref[l]                             # (I_pad, R)
            dist_sq = jnp.sum(diff * diff, axis=-1, keepdims=True)  # (I_pad, 1)
            phi = jnp.exp(dist_sq * s_ref[l])               # (I_pad, 1)  EUP
            # y_next[o] = sum_i phi[i] * W^T[i, o] + b[o]
            # (VPU broadcast-mul + XLU sublane reduce; no MXU round trip)
            y = jnp.sum(phi * w_ref[l], axis=0, keepdims=True) + b_ref[l]
        o_ref[...] = y

    return kernel


# --------------------------------------------------------------------------
# Host-side parameter repacking (done once, outside the hot path)
# --------------------------------------------------------------------------
def prepare_kernel_params(params, input_dim):
    """Pack torch-layout params into 4 stacked, zero-padded, lane-dense arrays.

    params: list of (w_re, w_im, b_re, b_im, g_re, g_im, sigma) with torch
    shapes W:(O,I), b:(O,), Gamma:(I,D_prev), sigma:(I,).

    Returns ((g_all, s_all, w_all, b_all), feat) where `feat` is the im
    offset inside each packed row.
    """
    num_layers = len(params)
    dims = [input_dim] + [w_re.shape[0] for (w_re, *_rest) in params]
    i_dims = [g_re.shape[0] for (_w_re, _w_im, _b_re, _b_im, g_re, *_r) in params]

    feat = max(dims)                                   # per-layer feature max
    row = max(128, _round_up(2 * feat, 128))           # lane-dense row width
    i_pad = max(8, _round_up(max(i_dims), 8))          # sublane-aligned

    g_all = np.zeros((num_layers, i_pad, row), np.float32)
    s_all = np.full((num_layers, i_pad, 1), -0.5, np.float32)
    w_all = np.zeros((num_layers, i_pad, row), np.float32)
    b_all = np.zeros((num_layers, 1, row), np.float32)

    for l, (w_re, w_im, b_re, b_im, g_re, g_im, sigma) in enumerate(params):
        o_l, i_l = np.asarray(w_re).shape
        d_prev = np.asarray(g_re).shape[1]
        g_all[l, :i_l, :d_prev] = np.asarray(g_re)
        g_all[l, :i_l, feat:feat + d_prev] = np.asarray(g_im)
        s_all[l, :i_l, 0] = -0.5 / np.asarray(sigma)
        w_all[l, :i_l, :o_l] = np.asarray(w_re).T
        w_all[l, :i_l, feat:feat + o_l] = np.asarray(w_im).T
        b_all[l, 0, :o_l] = np.asarray(b_re)
        b_all[l, 0, feat:feat + o_l] = np.asarray(b_im)

    arrays = tuple(jnp.asarray(a) for a in (g_all, s_all, w_all, b_all))
    return arrays, feat


@functools.partial(jax.jit, static_argnums=(3, 4))
def deep_complex_rbf_forward(x_re, x_im, param_arrays, feat, out_dim):
    """Forward pass. x_re/x_im: (D0,) float32. Returns (out_re, out_im)."""
    g_all, s_all, w_all, b_all = param_arrays
    num_layers, _, row = g_all.shape
    d0 = x_re.shape[0]

    # Pack the input into one lane-dense [re | im | 0] row.
    x_row = jnp.zeros((1, row), jnp.float32)
    x_row = x_row.at[0, :d0].set(x_re)
    x_row = x_row.at[0, feat:feat + d0].set(x_im)

    vmem = pl.BlockSpec(memory_space=pltpu.MemorySpace.VMEM)
    out = pl.pallas_call(
        _make_fused_kernel(num_layers),
        out_shape=jax.ShapeDtypeStruct((1, row), jnp.float32),
        in_specs=[vmem] * 5,
        out_specs=vmem,
    )(x_row, g_all, s_all, w_all, b_all)

    return out[0, :out_dim], out[0, feat:feat + out_dim]


# --------------------------------------------------------------------------
# Parameter init (mirrors DeepComplexRBF.__init__) and plain-JAX reference
# --------------------------------------------------------------------------
def init_params(key, input_dim, hidden_neurons, output_dim):
    num_layers = len(hidden_neurons)
    params = []
    o_prev = input_dim
    for l in range(1, num_layers + 1):
        i_l = hidden_neurons[l - 1]
        o_l = i_l if l < num_layers else output_dim
        key, k1, k2, k3, k4 = jax.random.split(key, 5)
        w_std = 1.0 / np.sqrt(i_l)
        c_std = 1.0 / np.sqrt(2.0 * o_prev)
        w_re = jax.random.normal(k1, (o_l, i_l), jnp.float32) * w_std
        w_im = jax.random.normal(k2, (o_l, i_l), jnp.float32) * w_std
        b_re = jnp.zeros((o_l,), jnp.float32)
        b_im = jnp.zeros((o_l,), jnp.float32)
        g_re = jax.random.normal(k3, (i_l, o_prev), jnp.float32) * c_std
        g_im = jax.random.normal(k4, (i_l, o_prev), jnp.float32) * c_std
        sigma = jnp.ones((i_l,), jnp.float32)
        params.append((w_re, w_im, b_re, b_im, g_re, g_im, sigma))
        o_prev = o_l
    return params


def reference_forward(x_re, x_im, params):
    """Plain-JAX (re/im split) mirror of the torch forward()."""
    y_re, y_im = x_re, x_im
    for (w_re, w_im, b_re, b_im, g_re, g_im, sigma) in params:
        diff_re = y_re[None, :] - g_re
        diff_im = y_im[None, :] - g_im
        dist_sq = jnp.sum(diff_re ** 2 + diff_im ** 2, axis=-1)
        phi = jnp.exp(-dist_sq / (2.0 * sigma))
        y_re = w_re @ phi + b_re
        y_im = w_im @ phi + b_im
    return y_re, y_im


if __name__ == "__main__":
    input_dim = 8
    hidden_neurons = [32, 16]
    output_dim = 2

    key = jax.random.PRNGKey(0)
    key, kx_re, kx_im = jax.random.split(key, 3)
    params = init_params(key, input_dim, hidden_neurons, output_dim)
    param_arrays, feat = prepare_kernel_params(params, input_dim)

    # x is a 1-D complex vector (the torch forward does W @ phi with phi 1-D)
    x_re = jax.random.normal(kx_re, (input_dim,), jnp.float32)
    x_im = jax.random.normal(kx_im, (input_dim,), jnp.float32)

    out_re, out_im = deep_complex_rbf_forward(x_re, x_im, param_arrays,
                                              feat, output_dim)
    jax.block_until_ready((out_re, out_im))

    ref_re, ref_im = reference_forward(x_re, x_im, params)
    np.testing.assert_allclose(np.asarray(out_re), np.asarray(ref_re),
                               rtol=1e-4, atol=1e-5)
    np.testing.assert_allclose(np.asarray(out_im), np.asarray(ref_im),
                               rtol=1e-4, atol=1e-5)
    print("KERNEL_OK")
</pallas_src>

<mosaic_0001>
module attributes {stable_mosaic.version = 11 : i64} {
  func.func @kernel(%arg0: memref<1x128xf32, #tpu.memory_space<vmem>>, %arg1: memref<2x32x128xf32, #tpu.memory_space<vmem>>, %arg2: memref<2x32x1xf32, #tpu.memory_space<vmem>>, %arg3: memref<2x32x128xf32, #tpu.memory_space<vmem>>, %arg4: memref<2x1x128xf32, #tpu.memory_space<vmem>>, %arg5: memref<1x128xf32, #tpu.memory_space<vmem>>) attributes {dimension_semantics = [], scalar_prefetch = 0 : i64, scratch_operands = 0 : i64, tpu.core_type = #tpu.core_type<tc>} {
    %c0 = arith.constant 0 : index
    %c0_0 = arith.constant 0 : index
    %0 = vector.load %arg0[%c0, %c0_0] : memref<1x128xf32, #tpu.memory_space<vmem>>, vector<1x128xf32>
    %c0_1 = arith.constant 0 : index
    %c0_2 = arith.constant 0 : index
    %c0_3 = arith.constant 0 : index
    %1 = vector.load %arg1[%c0_1, %c0_2, %c0_3] : memref<2x32x128xf32, #tpu.memory_space<vmem>>, vector<1x32x128xf32>
    %2 = vector.shape_cast %1 : vector<1x32x128xf32> to vector<32x128xf32>
    %3 = vector.broadcast %0 : vector<1x128xf32> to vector<32x128xf32>
    %4 = arith.subf %3, %2 : vector<32x128xf32>
    %5 = arith.mulf %4, %4 : vector<32x128xf32>
    %cst = arith.constant dense<0.000000e+00> : vector<32xf32>
    %6 = vector.multi_reduction <add>, %5, %cst [1] : vector<32x128xf32> to vector<32xf32>
    %7 = vector.shape_cast %6 : vector<32xf32> to vector<32x1xf32>
    %c0_4 = arith.constant 0 : index
    %c0_5 = arith.constant 0 : index
    %c0_6 = arith.constant 0 : index
    %8 = vector.load %arg2[%c0_4, %c0_5, %c0_6] : memref<2x32x1xf32, #tpu.memory_space<vmem>>, vector<1x32x1xf32>
    %9 = vector.shape_cast %8 : vector<1x32x1xf32> to vector<32x1xf32>
    %10 = arith.mulf %7, %9 : vector<32x1xf32>
    %11 = math.exp %10 : vector<32x1xf32>
    %c0_7 = arith.constant 0 : index
    %c0_8 = arith.constant 0 : index
    %c0_9 = arith.constant 0 : index
    %12 = vector.load %arg3[%c0_7, %c0_8, %c0_9] : memref<2x32x128xf32, #tpu.memory_space<vmem>>, vector<1x32x128xf32>
    %13 = vector.shape_cast %12 : vector<1x32x128xf32> to vector<32x128xf32>
    %14 = vector.broadcast %11 : vector<32x1xf32> to vector<32x128xf32>
    %15 = arith.mulf %14, %13 : vector<32x128xf32>
    %cst_10 = arith.constant dense<0.000000e+00> : vector<128xf32>
    %16 = vector.multi_reduction <add>, %15, %cst_10 [0] : vector<32x128xf32> to vector<128xf32>
    %17 = vector.shape_cast %16 : vector<128xf32> to vector<1x128xf32>
    %c0_11 = arith.constant 0 : index
    %c0_12 = arith.constant 0 : index
    %c0_13 = arith.constant 0 : index
    %18 = vector.load %arg4[%c0_11, %c0_12, %c0_13] : memref<2x1x128xf32, #tpu.memory_space<vmem>>, vector<1x1x128xf32>
    %19 = vector.shape_cast %18 : vector<1x1x128xf32> to vector<1x128xf32>
    %20 = arith.addf %17, %19 : vector<1x128xf32>
    %c1 = arith.constant 1 : index
    %c0_14 = arith.constant 0 : index
    %c0_15 = arith.constant 0 : index
    %21 = vector.load %arg1[%c1, %c0_14, %c0_15] : memref<2x32x128xf32, #tpu.memory_space<vmem>>, vector<1x32x128xf32>
    %22 = vector.shape_cast %21 : vector<1x32x128xf32> to vector<32x128xf32>
    %23 = vector.broadcast %20 : vector<1x128xf32> to vector<32x128xf32>
    %24 = arith.subf %23, %22 : vector<32x128xf32>
    %25 = arith.mulf %24, %24 : vector<32x128xf32>
    %cst_16 = arith.constant dense<0.000000e+00> : vector<32xf32>
    %26 = vector.multi_reduction <add>, %25, %cst_16 [1] : vector<32x128xf32> to vector<32xf32>
    %27 = vector.shape_cast %26 : vector<32xf32> to vector<32x1xf32>
    %c1_17 = arith.constant 1 : index
    %c0_18 = arith.constant 0 : index
    %c0_19 = arith.constant 0 : index
    %28 = vector.load %arg2[%c1_17, %c0_18, %c0_19] : memref<2x32x1xf32, #tpu.memory_space<vmem>>, vector<1x32x1xf32>
    %29 = vector.shape_cast %28 : vector<1x32x1xf32> to vector<32x1xf32>
    %30 = arith.mulf %27, %29 : vector<32x1xf32>
    %31 = math.exp %30 : vector<32x1xf32>
    %c1_20 = arith.constant 1 : index
    %c0_21 = arith.constant 0 : index
    %c0_22 = arith.constant 0 : index
    %32 = vector.load %arg3[%c1_20, %c0_21, %c0_22] : memref<2x32x128xf32, #tpu.memory_space<vmem>>, vector<1x32x128xf32>
    %33 = vector.shape_cast %32 : vector<1x32x128xf32> to vector<32x128xf32>
    %34 = vector.broadcast %31 : vector<32x1xf32> to vector<32x128xf32>
    %35 = arith.mulf %34, %33 : vector<32x128xf32>
    %cst_23 = arith.constant dense<0.000000e+00> : vector<128xf32>
    %36 = vector.multi_reduction <add>, %35, %cst_23 [0] : vector<32x128xf32> to vector<128xf32>
    %37 = vector.shape_cast %36 : vector<128xf32> to vector<1x128xf32>
    %c1_24 = arith.constant 1 : index
    %c0_25 = arith.constant 0 : index
    %c0_26 = arith.constant 0 : index
    %38 = vector.load %arg4[%c1_24, %c0_25, %c0_26] : memref<2x1x128xf32, #tpu.memory_space<vmem>>, vector<1x1x128xf32>
    %39 = vector.shape_cast %38 : vector<1x1x128xf32> to vector<1x128xf32>
    %40 = arith.addf %37, %39 : vector<1x128xf32>
    %c0_27 = arith.constant 0 : index
    %c0_28 = arith.constant 0 : index
    %41 = vector.load %arg5[%c0_27, %c0_28] : memref<1x128xf32, #tpu.memory_space<vmem>>, vector<1x128xf32>
    tpu.vector_store %arg5[%c0_27, %c0_28], %40 {strides = array<i32>} : memref<1x128xf32, #tpu.memory_space<vmem>>, vector<1x128xf32>,
    return
  }
}

</mosaic_0001>

<bundles_post_ra>
// kernel: deep_complex_rbf_forward.1
= control target key start
LH: loop header
LB: loop body
LE: loop exit
PB: predicated region body
PF: predicated region fallthrough
CT: control target
= control target key end

     0   :  { %10 = vsyncpa [#allocation3], 0  ;;  %s260_s21 = smov [#allocation2]   ;;  %s261_s23 = smov 128   ;;  %s357_s0 = inlined_call_operand.vmem [shape: f32[1,128], index: 0, kind: input, shape index: {}]   ;;  %s358_s1 = inlined_call_operand.vmem [shape: f32[2,32,128], index: 1, kind: input, shape index: {}]   ;;  %s359_s2 = inlined_call_operand.vmem [shape: f32[2,32,1], index: 2, kind: input, shape index: {}]   ;;  %s360_s3 = inlined_call_operand.hbm [shape: f32[2,32,128], index: 3, kind: input, shape index: {}]   ;;  %s361_s4 = inlined_call_operand.vmem [shape: f32[2,1,128], index: 4, kind: input, shape index: {}]   ;;  %s362_s5 = inlined_call_operand.vmem [shape: f32[1,128], index: 5, kind: output, shape index: {}]  }
   0x1   :  { %s21_s20 = sshll.u32 %s360_s3, 4  ;;  %s23_s22 = sshll.u32 %s260_s21, 4  ;;  %s22_s20 = int_to_ptr.hbm [resolvable:$true] %s21_s20  ;;  %s24_s22 = int_to_ptr.vmem [resolvable:$true] %s23_s22 }
   0x2   :  { %s262_s24 = smov 8  }
   0x3   :  { %29 = dma.hbm_to_vmem [thread:$0]  %s22_s20, 1024, %s24_s22, [#allocation3], %s261_s23, %s261_s23, %s262_s24  }
   0x4   :  { %258 = dma.done.wait [#allocation3], 1024  }
   0x5   :  { %259 = vsyncadd [#allocation3], 4294966272  ;;  %v39_v0 = vld [vmem:[%s358_s1 + $0x10] sm:$0xff]  ;;  %v217_v1 = vld [vmem:[%s357_s0] ss:$0 sm:$0xff]  ;;  %v263_v13 = vmov 0  }
   0x6   :  { %v37_v2 = vld [vmem:[%s358_s1] sm:$0xff]  ;;  %v46_v3 = vsub.f32 %v217_v1, %v39_v0  ;;  %v40_v5 = vld [vmem:[%s358_s1 + $0x18] sm:$0xff]  ;;  %v38_v6 = vld [vmem:[%s358_s1 + $0x8] sm:$0xff]  ;;  %215 = vset.pattern.permute.xlu0 %v263_v13  ;;  %216 = vset.pattern.permute.xlu1 %v263_v13 }
   0x7   :  { %v44_v4 = vsub.f32 %v217_v1, %v37_v2  ;;  %v47_v9 = vsub.f32 %v217_v1, %v40_v5  ;;  %v45_v10 = vsub.f32 %v217_v1, %v38_v6  ;;  %214 = vset.pattern.permute.xlu2 %v263_v13  ;;  %v62_v14 = vld [vmem:[%s359_s2 + $0x10] sm:$0xff]  ;;  %v60_v15 = vld [vmem:[%s359_s2] sm:$0xff]  ;;  %v63_v22 = vld [vmem:[%s359_s2 + $0x18] sm:$0xff] }
   0x8   :  { %v50_v7 = vmul.f32 %v46_v3, %v46_v3  ;;  %v61_v23 = vld [vmem:[%s359_s2 + $0x8] sm:$0xff]  ;;  %v76_v35 = vld [vmem:[#allocation2] sm:$0xff]  ;;  %v78_v38 = vld [vmem:[#allocation2 + $0x10] sm:$0xff] }
   0x9   :  { %v48_v8 = vmul.f32 %v44_v4, %v44_v4  ;;  %v51_v11 = vmul.f32 %v47_v9, %v47_v9  ;;  %v49_v12 = vmul.f32 %v45_v10, %v45_v10  ;;  %v77_v36 = vld [vmem:[#allocation2 + $0x8] sm:$0xff]  ;;  %v79_v43 = vld [vmem:[#allocation2 + $0x18] sm:$0xff]  ;;  %v113_v54 = vld [vmem:[%s361_s4] sm:$0x1] }
   0xa   :  { %56 = vadd.xlane.f32.xlu1 %v50_v7  ;;  %v203_v57 = vld [vmem:[%s358_s1 + $0x30] sm:$0xff]  ;;  %v202_v58 = vld [vmem:[%s358_s1 + $0x28] sm:$0xff]  ;;  %v201_v59 = vld [vmem:[%s358_s1 + $0x20] sm:$0xff] }
   0xb   :  { %52 = vadd.xlane.f32.xlu0 %v48_v8  ;;  %v204_v3 = vld [vmem:[%s358_s1 + $0x38] sm:$0xff]  ;;  %v206_v6 = vld [vmem:[%s359_s2 + $0x28] sm:$0xff]  ;;  %v205_v7 = vld [vmem:[%s359_s2 + $0x20] sm:$0xff] }
   0xc   :  { %v207_v13 = vld [vmem:[%s359_s2 + $0x30] sm:$0xff] }
  0x12   :  { %58 = vadd.xlane.f32.xlu1 %v51_v11 }
  0x13   :  { %54 = vadd.xlane.f32.xlu0 %v49_v12 }
  0x7d   :  { %v57_v16 = vpop.xlane.xlu1 %56 }
  0x7e   :  { %v53_v17 = vpop.xlane.xlu0 %52  ;;  %v66_v18 = vmul.f32 %v62_v14, %v57_v16 }
  0x7f   :  { %v64_v19 = vmul.f32 %v60_v15, %v53_v17 }
  0x80   :  { %v72_v20 = vmul.f32 1.442695, %v66_v18 }
  0x81   :  { %v68_v21 = vmul.f32 1.442695, %v64_v19  ;;  %v208_v19 = vld [vmem:[%s359_s2 + $0x38] sm:$0xff] }
  0x82   :  { %218 = vpow2.f32 %v72_v20 }
  0x83   :  { %220 = vpow2.f32 %v68_v21 }
  0x85   :  { %v59_v24 = vpop.xlane.xlu1 %58 }
  0x86   :  { %v55_v25 = vpop.xlane.xlu0 %54  ;;  %v67_v26 = vmul.f32 %v63_v22, %v59_v24 }
  0x87   :  { %v65_v27 = vmul.f32 %v61_v23, %v55_v25 }
  0x88   :  { %v219_v28 = vpop.eup %218  ;;  %v74_v29 = vmul.f32 1.442695, %v67_v26 }
  0x89   :  { %v70_v30 = vmul.f32 1.442695, %v65_v27  ;;  %v221_v31 = vpop.eup %220  ;;  %92 = vperm.xlu0 %215, %v219_v28   ;;  %v155_v28 = vld [vmem:[#allocation2 + $0x20] sm:$0xff] }
  0x8a   :  { %222 = vpow2.f32 %v74_v29  ;;  %82 = vperm.xlu2 %214, %v221_v31   ;;  %v156_v29 = vld [vmem:[#allocation2 + $0x28] sm:$0xff] }
  0x8b   :  { %224 = vpow2.f32 %v70_v30  ;;  %v157_v30 = vld [vmem:[#allocation2 + $0x30] sm:$0xff] }
  0x90   :  { %v223_v32 = vpop.eup %222 }
  0x91   :  { %v225_v33 = vpop.eup %224  ;;  %97 = vperm.xlu1 %216, %v223_v32  }
  0x92   :  { %87 = vperm.xlu2 %214, %v225_v33  }
  0xe4   :  { %v83_v34 = vpop.permute.xlu2 %82 }
  0xe5   :  { %v100_v40 = vmul.f32 %v83_v34, %v76_v35  ;;  %v158_v34 = vld [vmem:[#allocation2 + $0x38] sm:$0xff] }
  0xec   :  { %v88_v37 = vpop.permute.xlu2 %87 }
  0xed   :  { %v101_v41 = vmul.f32 %v88_v37, %v77_v36 }
  0xef   :  { %v104_v44 = vadd.f32 %v101_v41, %v100_v40 }
  0xfb   :  { %v93_v39 = vpop.permute.xlu0 %92 }
  0xfc   :  { %v102_v42 = vmul.f32 %v93_v39, %v78_v38 }
  0xfe   :  { %v105_v46 = vadd.f32 %v104_v44, %v102_v42 }
 0x103   :  { %v98_v45 = vpop.permute.xlu1 %97 }
 0x104   :  { %v103_v47 = vmul.f32 %v98_v45, %v79_v43 }
 0x106   :  { %v106_v48 = vadd.f32 %v105_v46, %v103_v47  ;;  %v209_v46 = vld [vmem:[%s361_s4 + $0x1] sm:$0x1] }
 0x108   :  { %v107_v49 = vrot.slane %v106_v48, 4 }
 0x10a   :  { %v108_v50 = vadd.f32 %v107_v49, %v106_v48 }
 0x10c   :  { %v109_v51 = vrot.slane %v108_v50, 2 }
 0x10e   :  { %v110_v52 = vadd.f32 %v109_v51, %v108_v50 }
 0x110   :  { %v111_v53 = vrot.slane %v110_v52, 1 }
 0x112   :  { %v112_v55 = vadd.f32 %v111_v53, %v110_v52 }
 0x114   :  { %v114_v56 = vadd.f32 %v113_v54, %v112_v55 }
 0x116   :  { %v120_v60 = vperm.slane %v114_v56, 0 }
 0x118   :  { %v123_v61 = vsub.f32 %v120_v60, %v203_v57  ;;  %v122_v62 = vsub.f32 %v120_v60, %v202_v58  ;;  %v121_v63 = vsub.f32 %v120_v60, %v201_v59  ;;  %v124_v4 = vsub.f32 %v120_v60, %v204_v3 }
 0x11a   :  { %v127_v0 = vmul.f32 %v123_v61, %v123_v61  ;;  %v126_v1 = vmul.f32 %v122_v62, %v122_v62  ;;  %v125_v2 = vmul.f32 %v121_v63, %v121_v63  ;;  %v128_v5 = vmul.f32 %v124_v4, %v124_v4 }
 0x11c   :  { %133 = vadd.xlane.f32.xlu0 %v127_v0  ;;  %131 = vadd.xlane.f32.xlu1 %v126_v1 }
 0x11d   :  { %129 = vadd.xlane.f32.xlu2 %v125_v2 }
 0x125   :  { %135 = vadd.xlane.f32.xlu2 %v128_v5 }
 0x18f   :  { %v132_v8 = vpop.xlane.xlu1 %131  ;;  %v134_v14 = vpop.xlane.xlu0 %133 }
 0x190   :  { %v143_v9 = vmul.f32 %v206_v6, %v132_v8  ;;  %v130_v10 = vpop.xlane.xlu2 %129  ;;  %v144_v16 = vmul.f32 %v207_v13, %v134_v14 }
 0x191   :  { %v142_v11 = vmul.f32 %v205_v7, %v130_v10 }
 0x192   :  { %v148_v12 = vmul.f32 1.442695, %v143_v9  ;;  %v150_v17 = vmul.f32 1.442695, %v144_v16 }
 0x193   :  { %v146_v15 = vmul.f32 1.442695, %v142_v11 }
 0x194   :  { %226 = vpow2.f32 %v148_v12 }
 0x195   :  { %228 = vpow2.f32 %v146_v15 }
 0x196   :  { %230 = vpow2.f32 %v150_v17 }
 0x198   :  { %v136_v20 = vpop.xlane.xlu2 %135 }
 0x199   :  { %v145_v22 = vmul.f32 %v208_v19, %v136_v20 }
 0x19a   :  { %v227_v18 = vpop.eup %226 }
 0x19b   :  { %v229_v21 = vpop.eup %228  ;;  %166 = vperm.xlu1 %216, %v227_v18   ;;  %v152_v23 = vmul.f32 1.442695, %v145_v22 }
 0x19c   :  { %161 = vperm.xlu2 %214, %v229_v21   ;;  %v231_v24 = vpop.eup %230 }
 0x19d   :  { %232 = vpow2.f32 %v152_v23 }
 0x1a3   :  { %v233_v25 = vpop.eup %232 }
 0x1a4   :  { %171 = vperm.xlu2 %214, %v231_v24  }
 0x1ac   :  { %176 = vperm.xlu2 %214, %v233_v25  }
 0x1f6   :  { %v162_v26 = vpop.permute.xlu2 %161 }
 0x1f7   :  { %v179_v32 = vmul.f32 %v162_v26, %v155_v28 }
 0x1fe   :  { %v172_v27 = vpop.permute.xlu2 %171 }
 0x1ff   :  { %v181_v36 = vmul.f32 %v172_v27, %v157_v30 }
 0x206   :  { %v177_v35 = vpop.permute.xlu2 %176 }
 0x207   :  { %v182_v38 = vmul.f32 %v177_v35, %v158_v34 }
 0x20d   :  { %v167_v31 = vpop.permute.xlu1 %166 }
 0x20e   :  { %v180_v33 = vmul.f32 %v167_v31, %v156_v29 }
 0x210   :  { %v183_v37 = vadd.f32 %v180_v33, %v179_v32 }
 0x212   :  { %v184_v39 = vadd.f32 %v183_v37, %v181_v36 }
 0x214   :  { %v185_v40 = vadd.f32 %v184_v39, %v182_v38 }
 0x216   :  { %v186_v41 = vrot.slane %v185_v40, 4 }
 0x218   :  { %v187_v42 = vadd.f32 %v186_v41, %v185_v40 }
 0x21a   :  { %v188_v43 = vrot.slane %v187_v42, 2 }
 0x21c   :  { %v189_v44 = vadd.f32 %v188_v43, %v187_v42 }
 0x21e   :  { %v190_v45 = vrot.slane %v189_v44, 1 }
 0x220   :  { %v191_v47 = vadd.f32 %v190_v45, %v189_v44 }
 0x222   :  { %v194_v48 = vadd.f32 %v209_v46, %v191_v47 }
 0x224   :  { %195 = vst [vmem:[%s362_s5] sm:$0x1] %v194_v48 }
 0x225   :  { %200 = vsyncpa [#allocation3], 1 }

</bundles_post_ra>
